<compile_context>
chip_gen: v7x
topology: tpu7x:2x2x1
jax: 0.10.0
libtpu: 0.0.40
codegen_flags: <defaults>
</compile_context>

<pallas_src>
import functools

import jax
import jax.numpy as jnp
from jax import lax
from jax.experimental import pallas as pl
from jax.experimental.pallas import tpu as pltpu


def _round_up(x, m):
    return ((x + m - 1) // m) * m


def _memory_fwd_kernel(tok_ref, mem_t_ref, mem_ref, upd_ref, attn_ref, *, c_valid):
    # tok_ref   : (TM, D)       row tile of flattened tokens (f32 or bf16)
    # mem_t_ref : (D, C_pad)    memory, pre-transposed (VMEM-resident)
    # mem_ref   : (C_pad, D)    memory (VMEM-resident)
    # upd_ref   : (TM, D)       updated-tokens output tile
    # attn_ref  : (TM, C_pad)   attention output tile (lane-dense, padded cls)
    tok = tok_ref[...]
    mem_t = mem_t_ref[...]
    mem = mem_ref[...]

    # similarity = tokens @ memory.T -> (TM, C_pad); plain MXU matmul (memory
    # was transposed once in the wrapper, no in-kernel transpose).
    sim = jnp.dot(tok, mem_t, preferred_element_type=jnp.float32)

    # Mask padded classes so softmax matches the unpadded op exactly.
    c_pad = sim.shape[-1]
    if c_valid < c_pad:
        col = lax.broadcasted_iota(jnp.int32, sim.shape, 1)
        sim = jnp.where(col < c_valid, sim, jnp.float32(-1e30))

    # Numerically-stable softmax over the class axis (f32 math).
    m = jnp.max(sim, axis=-1, keepdims=True)
    e = jnp.exp(sim - m)
    denom = jnp.sum(e, axis=-1, keepdims=True)
    attn = e * pl.reciprocal(denom, approx=True)        # EUP, not VALU divide

    # updated_tokens = attention @ memory -> (TM, D); padded classes have
    # attention ~0 and zero memory rows, so they contribute exactly 0.
    upd = jnp.dot(attn.astype(mem.dtype), mem, preferred_element_type=jnp.float32)

    attn_ref[...] = attn.astype(attn_ref.dtype)
    upd_ref[...] = upd.astype(upd_ref.dtype)


@functools.partial(jax.jit, static_argnames=("use_bf16_matmul", "max_block_rows"))
def memory_module_forward(semantic_tokens, memory_tensor, *,
                          use_bf16_matmul=True, max_block_rows=1024):
    """Pallas implementation of MemoryModule.forward.

    semantic_tokens: (B, N, D)
    memory_tensor:   (C, D)
    returns (updated_tokens (B, N, D), attention (B, N, C))
    """
    B, N, D = semantic_tokens.shape
    C, D2 = memory_tensor.shape
    assert D == D2, "token_dim mismatch"

    out_dtype = semantic_tokens.dtype
    LANE, SUB = 128, 8

    rows = B * N
    c_pad = _round_up(max(C, 1), LANE)          # lane-dense attention output

    # MXU operand dtype: bf16 halves token HBM traffic & doubles MXU rate on
    # v6e/v7x; accumulation stays f32.  use_bf16_matmul=False keeps exact f32
    # operands (apart from the approx reciprocal).
    op_dtype = jnp.bfloat16 if use_bf16_matmul else semantic_tokens.dtype

    tok2d = semantic_tokens.reshape(rows, D).astype(op_dtype)
    mem_p = jnp.pad(memory_tensor.astype(op_dtype), ((0, c_pad - C), (0, 0)))
    mem_t_p = jnp.transpose(mem_p)               # transposed ONCE, outside kernel

    # Largest 8-aligned row tile within a VMEM budget that fits the default
    # scoped limit on every generation (v5e 16 MiB ... v7x 32 MiB).
    tok_bytes = jnp.dtype(op_dtype).itemsize
    out_bytes = jnp.dtype(out_dtype).itemsize
    bytes_per_row = 2 * (tok_bytes * D           # token tile   (double-buffered)
                         + out_bytes * D         # upd tile     (double-buffered)
                         + out_bytes * c_pad)    # attn tile    (double-buffered)
    budget = 12 * 1024 * 1024
    tm = max(SUB, min(max_block_rows, budget // max(bytes_per_row, 1)))
    tm = max(SUB, (tm // SUB) * SUB)
    tm = min(tm, _round_up(rows, SUB))
    rows_pad = _round_up(rows, tm)
    if rows_pad != rows:
        tok2d = jnp.pad(tok2d, ((0, rows_pad - rows), (0, 0)))

    grid = (rows_pad // tm,)
    kernel = functools.partial(_memory_fwd_kernel, c_valid=C)

    cost = pl.CostEstimate(
        flops=4 * rows_pad * D * c_pad,                     # two matmuls
        transcendentals=rows_pad * c_pad + rows_pad,        # exp + reciprocal
        bytes_accessed=(rows_pad * D * tok_bytes            # token stream in
                        + 2 * c_pad * D * tok_bytes         # memory (+ transpose)
                        + rows_pad * D * out_bytes          # updated tokens out
                        + rows_pad * c_pad * out_bytes),    # attention out
    )

    grid_spec = pltpu.PrefetchScalarGridSpec(
        num_scalar_prefetch=0,
        grid=grid,
        in_specs=[
            pl.BlockSpec((tm, D), lambda i: (i, 0)),        # token row tile
            # Constant index_map -> fetched once, VMEM-resident across tiles.
            pl.BlockSpec((D, c_pad), lambda i: (0, 0)),     # memory^T
            pl.BlockSpec((c_pad, D), lambda i: (0, 0)),     # memory
        ],
        out_specs=[
            pl.BlockSpec((tm, D), lambda i: (i, 0)),        # updated tokens
            pl.BlockSpec((tm, c_pad), lambda i: (i, 0)),    # attention (lane-dense)
        ],
    )

    upd_p, attn_p = pl.pallas_call(
        kernel,
        out_shape=(
            jax.ShapeDtypeStruct((rows_pad, D), out_dtype),
            jax.ShapeDtypeStruct((rows_pad, c_pad), out_dtype),
        ),
        grid_spec=grid_spec,
        compiler_params=pltpu.CompilerParams(
            dimension_semantics=("parallel",),
        ),
        cost_estimate=cost,
    )(tok2d, mem_t_p, mem_p)

    updated_tokens = upd_p[:rows].reshape(B, N, D)
    attention = attn_p[:rows, :C].reshape(B, N, C)
    return updated_tokens, attention


def _reference_forward(semantic_tokens, memory_tensor):
    sim = jnp.einsum("bnd,cd->bnc", semantic_tokens, memory_tensor)
    attn = jax.nn.softmax(sim, axis=-1)
    upd = jnp.einsum("bnc,cd->bnd", attn, memory_tensor)
    return upd, attn


if __name__ == "__main__":
    # Small shapes consistent with the module: batch=2, num_tokens=8,
    # token_dim=32, cls_num=4.
    B, N, D, C = 2, 8, 32, 4

    key = jax.random.PRNGKey(0)
    k_tok, k_mem = jax.random.split(key)

    semantic_tokens = jax.random.normal(k_tok, (B, N, D), dtype=jnp.float32)
    # Deterministic synthetic parameter init (stands in for torch.randn).
    memory_tensor = jax.random.normal(k_mem, (C, D), dtype=jnp.float32)

    upd_ref, attn_ref = _reference_forward(semantic_tokens, memory_tensor)

    # f32 MXU operands: tight sanity check (approx reciprocal only).
    upd32, attn32 = memory_module_forward(semantic_tokens, memory_tensor,
                                          use_bf16_matmul=False)
    upd32 = jax.block_until_ready(upd32)
    attn32 = jax.block_until_ready(attn32)
    assert upd32.shape == (B, N, D) and attn32.shape == (B, N, C)
    assert jnp.allclose(upd32, upd_ref, atol=1e-2, rtol=1e-2)
    assert jnp.allclose(attn32, attn_ref, atol=1e-2, rtol=1e-2)

    # bf16 MXU operands (v6e/v7x fast path): looser tolerance vs f32 reference.
    upd16, attn16 = memory_module_forward(semantic_tokens, memory_tensor,
                                          use_bf16_matmul=True)
    upd16 = jax.block_until_ready(upd16)
    attn16 = jax.block_until_ready(attn16)
    assert upd16.shape == (B, N, D) and attn16.shape == (B, N, C)
    assert jnp.allclose(upd16, upd_ref, atol=1e-1, rtol=1e-1)
    assert jnp.allclose(attn16, attn_ref, atol=1e-1, rtol=1e-1)

    # TODO(synk): update_memory (EMA update of the memory parameter + the
    # freshness buffer) is a stateful training-time side effect, not part of
    # forward, so it is intentionally not implemented here.
    print("KERNEL_OK")
</pallas_src>

<mosaic_0001>
module attributes {stable_mosaic.version = 11 : i64} {
  func.func @_memory_fwd_kernel(%arg0: i32, %arg1: memref<16x32xf32, #tpu.memory_space<vmem>>, %arg2: memref<32x128xf32, #tpu.memory_space<vmem>>, %arg3: memref<128x32xf32, #tpu.memory_space<vmem>>, %arg4: memref<16x32xf32, #tpu.memory_space<vmem>>, %arg5: memref<16x128xf32, #tpu.memory_space<vmem>>) attributes {dimension_semantics = [#tpu.dimension_semantics<parallel>], iteration_bounds = array<i64: 1>, scalar_prefetch = 0 : i64, scratch_operands = 0 : i64, tpu.core_type = #tpu.core_type<tc>, window_params = [{transform_indices = @transform_0, window_bounds = array<i64: 16, 32>}, {pipeline_mode = #tpu.pipeline_mode<synchronous>, transform_indices = @transform_1, window_bounds = array<i64: 32, 128>}, {pipeline_mode = #tpu.pipeline_mode<synchronous>, transform_indices = @transform_2, window_bounds = array<i64: 128, 32>}, {transform_indices = @transform_3, window_bounds = array<i64: 16, 32>}, {transform_indices = @transform_4, window_bounds = array<i64: 16, 128>}]} {
    %c0 = arith.constant 0 : index
    %c0_0 = arith.constant 0 : index
    %0 = vector.load %arg1[%c0, %c0_0] : memref<16x32xf32, #tpu.memory_space<vmem>>, vector<16x32xf32>
    %c0_1 = arith.constant 0 : index
    %c0_2 = arith.constant 0 : index
    %1 = vector.load %arg2[%c0_1, %c0_2] : memref<32x128xf32, #tpu.memory_space<vmem>>, vector<32x128xf32>
    %c0_3 = arith.constant 0 : index
    %c0_4 = arith.constant 0 : index
    %2 = vector.load %arg3[%c0_3, %c0_4] : memref<128x32xf32, #tpu.memory_space<vmem>>, vector<128x32xf32>
    %cst = arith.constant dense<0.000000e+00> : vector<16x128xf32>
    %3 = tpu.matmul %0, %1, %cst {dimension_numbers = #tpu.dot_dimension_numbers<[1], [0], [0], [1], [0, 0, 1, 1], [], []>} : vector<16x32xf32>, vector<32x128xf32>, vector<16x128xf32> -> vector<16x128xf32>
    %4 = tpu.iota {dimensions = array<i32: 1>} : vector<16x128xi32>
    %c4_i32 = arith.constant 4 : i32
    %5 = vector.broadcast %c4_i32 : i32 to vector<16x128xi32>
    %6 = arith.cmpi slt, %4, %5 : vector<16x128xi32>
    %cst_5 = arith.constant -1.000000e+30 : f32
    %7 = vector.broadcast %cst_5 : f32 to vector<16x128xf32>
    %8 = arith.select %6, %3, %7 : vector<16x128xi1>, vector<16x128xf32>
    %cst_6 = arith.constant dense<0xFF800000> : vector<16xf32>
    %9 = vector.multi_reduction <maximumf>, %8, %cst_6 [1] : vector<16x128xf32> to vector<16xf32>
    %10 = vector.shape_cast %9 : vector<16xf32> to vector<16x1xf32>
    %11 = vector.broadcast %10 : vector<16x1xf32> to vector<16x128xf32>
    %12 = arith.subf %8, %11 : vector<16x128xf32>
    %13 = math.exp %12 : vector<16x128xf32>
    %cst_7 = arith.constant dense<0.000000e+00> : vector<16xf32>
    %14 = vector.multi_reduction <add>, %13, %cst_7 [1] : vector<16x128xf32> to vector<16xf32>
    %15 = vector.shape_cast %14 : vector<16xf32> to vector<16x1xf32>
    %16 = tpu.reciprocal %15 {approx = true} : vector<16x1xf32> -> vector<16x1xf32>
    %17 = vector.broadcast %16 : vector<16x1xf32> to vector<16x128xf32>
    %18 = arith.mulf %13, %17 : vector<16x128xf32>
    %cst_8 = arith.constant dense<0.000000e+00> : vector<16x32xf32>
    %19 = tpu.matmul %18, %2, %cst_8 {dimension_numbers = #tpu.dot_dimension_numbers<[1], [0], [0], [1], [0, 0, 1, 1], [], []>} : vector<16x128xf32>, vector<128x32xf32>, vector<16x32xf32> -> vector<16x32xf32>
    %c0_9 = arith.constant 0 : index
    %c0_10 = arith.constant 0 : index
    %20 = vector.load %arg5[%c0_9, %c0_10] : memref<16x128xf32, #tpu.memory_space<vmem>>, vector<16x128xf32>
    tpu.vector_store %arg5[%c0_9, %c0_10], %18 {strides = array<i32>} : memref<16x128xf32, #tpu.memory_space<vmem>>, vector<16x128xf32>,
    %c0_11 = arith.constant 0 : index
    %c0_12 = arith.constant 0 : index
    %21 = vector.load %arg4[%c0_11, %c0_12] : memref<16x32xf32, #tpu.memory_space<vmem>>, vector<16x32xf32>
    tpu.vector_store %arg4[%c0_11, %c0_12], %19 {strides = array<i32>} : memref<16x32xf32, #tpu.memory_space<vmem>>, vector<16x32xf32>,
    return
  }
  func.func @transform_0(%arg0: i32) -> (i32, i32) {
    %c0_i32 = arith.constant 0 : i32
    %c0_i32_0 = arith.constant 0 : i32
    return %arg0, %c0_i32 : i32, i32
  }
  func.func @transform_1(%arg0: i32) -> (i32, i32) {
    %c0_i32 = arith.constant 0 : i32
    %c0_i32_0 = arith.constant 0 : i32
    %c0_i32_1 = arith.constant 0 : i32
    return %c0_i32, %c0_i32_0 : i32, i32
  }
  func.func @transform_2(%arg0: i32) -> (i32, i32) {
    %c0_i32 = arith.constant 0 : i32
    %c0_i32_0 = arith.constant 0 : i32
    %c0_i32_1 = arith.constant 0 : i32
    return %c0_i32, %c0_i32_0 : i32, i32
  }
  func.func @transform_3(%arg0: i32) -> (i32, i32) {
    %c0_i32 = arith.constant 0 : i32
    %c0_i32_0 = arith.constant 0 : i32
    return %arg0, %c0_i32 : i32, i32
  }
  func.func @transform_4(%arg0: i32) -> (i32, i32) {
    %c0_i32 = arith.constant 0 : i32
    %c0_i32_0 = arith.constant 0 : i32
    return %arg0, %c0_i32 : i32, i32
  }
}

</mosaic_0001>

<bundles_post_ra>
// kernel: memory_module_forward.1
= control target key start
LH: loop header
LB: loop body
LE: loop exit
PB: predicated region body
PF: predicated region fallthrough
CT: control target
= control target key end

     0   :  { %vm39_vm0 = vcmask 261120   ;;  %s506_s0 = inlined_call_operand.vmem [shape: f32[16,32], index: 0, kind: input, shape index: {}]   ;;  %s507_s1 = inlined_call_operand.vmem [shape: f32[32,128], index: 1, kind: input, shape index: {}]   ;;  %s508_s2 = inlined_call_operand.vmem [shape: f32[128,32], index: 2, kind: input, shape index: {}]   ;;  %s509_s3 = inlined_call_operand.hbm [shape: f32[16,32], index: 3, kind: output, shape index: {0}]   ;;  %s510_s4 = inlined_call_operand.vmem [shape: f32[16,128], index: 4, kind: output, shape index: {1}]  }
   0x1   :  { %v19_v0 = vld [vmem:[%s507_s1] sm:$0xff]  ;;  %v20_v1 = vld [vmem:[%s507_s1 + $0x8] sm:$0xff]  ;;  %v21_v2 = vld [vmem:[%s507_s1 + $0x10] sm:$0xff] }
   0x2   :  { %v315_v3 = vpack.c.bf16 %v20_v1, %v19_v0  ;;  %v22_v4 = vld [vmem:[%s507_s1 + $0x18] sm:$0xff]  ;;  %v17_v5 = vld [vmem:[%s506_s0] sm:$0xff] }
   0x3   :  { %v319_v6 = vpack.c.bf16 %v22_v4, %v21_v2  ;;  %277 = vmatprep.mubr.msk.f32.mxu0 %vm39_vm0, %v17_v5 }
   0x4   :  { %10 = vsyncpa [#allocation3], 0  ;;  %316 = vmatprep.subr.bf16.mxu0 %v315_v3  ;;  %v18_v7 = vld [vmem:[%s506_s0 + $0x8] sm:$0xff]  ;;  %v121_v8 = vlaneseq  ;;  %v23_v14 = vld [vmem:[%s508_s2] sm:$0xff]  ;;  %s390_s6 = smov [#allocation2]  }
   0x5   :  { %318 = vmatpush3.bf16.msra.mxu0 %v315_v3  ;;  %v24_v15 = vld [vmem:[%s508_s2 + $0x8] sm:$0xff]  ;;  %v25_v16 = vld [vmem:[%s508_s2 + $0x10] sm:$0xff]  ;;  %v26_v18 = vld [vmem:[%s508_s2 + $0x18] sm:$0xff]  ;;  %s228_s7 = sshll.u32 %s390_s6, 4  ;;  %s229_s7 = int_to_ptr.vmem [resolvable:$true] %s228_s7 }
   0x6   :  { %320 = vmatprep.subr.bf16.mxu0 %v319_v6  ;;  %v122_v9 = vand.u32 127, %v121_v8  ;;  %v323_v17 = vpack.c.bf16 %v24_v15, %v23_v14  ;;  %v327_v19 = vpack.c.bf16 %v26_v18, %v25_v16  ;;  %v27_v20 = vld [vmem:[%s508_s2 + $0x20] sm:$0xff]  ;;  %v28_v21 = vld [vmem:[%s508_s2 + $0x28] sm:$0xff]  ;;  %v29_v23 = vld [vmem:[%s508_s2 + $0x30] sm:$0xff]  ;;  %s366_s8 = scalar_lea.vmem %s229_s7, 256  ;;  %p371_p1 = scmp.lt.s32.totalorder %s229_s7, %s229_s7 }
   0x7   :  { %v331_v22 = vpack.c.bf16 %v28_v21, %v27_v20  ;;  %v30_v24 = vld [vmem:[%s508_s2 + $0x38] sm:$0xff]  ;;  %v31_v34 = vld [vmem:[%s508_s2 + $0x40] sm:$0xff]  ;;  %v32_v35 = vld [vmem:[%s508_s2 + $0x48] sm:$0xff]  ;;  %p367_p0 = scmp.ne.s32.totalorder %s229_s7, %s366_s8  ;;  %p372_p2 = scmp.lt.s32.totalorder %s366_s8, %s366_s8 }
   0x8   :  { %vm123_vm1 = vcmp.lt.s32.totalorder %v122_v9, 4  ;;  %324 = vmatprep.subr.bf16.mxu1 %v323_v17  ;;  %v335_v25 = vpack.c.bf16 %v30_v24, %v29_v23  ;;  %v339_v36 = vpack.c.bf16 %v32_v35, %v31_v34  ;;  %v33_v37 = vld [vmem:[%s508_s2 + $0x50] sm:$0xff]  ;;  %v34_v38 = vld [vmem:[%s508_s2 + $0x58] sm:$0xff]  ;;  %v35_v40 = vld [vmem:[%s508_s2 + $0x60] sm:$0xff] }
   0x9   :  { %322 = vmatpush3.bf16.msra.mxu0 %v319_v6  ;;  %326 = vmatpush3.bf16.msra.mxu1 %v323_v17  ;;  %v343_v39 = vpack.c.bf16 %v34_v38, %v33_v37  ;;  %v36_v41 = vld [vmem:[%s508_s2 + $0x68] sm:$0xff]  ;;  %v37_v42 = vld [vmem:[%s508_s2 + $0x70] sm:$0xff]  ;;  %v38_v44 = vld [vmem:[%s508_s2 + $0x78] sm:$0xff]  ;;  %p373_p3 = por %p372_p2, %p371_p1 }
   0xa   :  { %328 = vmatprep.subr.bf16.mxu1 %v327_v19  ;;  %v347_v43 = vpack.c.bf16 %v36_v41, %v35_v40  ;;  %v351_v45 = vpack.c.bf16 %v38_v44, %v37_v42 }
   0xb   :  { %p374_p4 = pnand %p373_p3, %p367_p0 }
   0xc   :  { %278 = vmatmul.mubr.msk.f32.vlgmr.msra.gmra.mrb[0].mxu0 %vm39_vm0, %v18_v7 }
   0xd   :  { %330 = vmatpush3.bf16.msra.mxu1 %v327_v19 }
   0xe   :  { %332 = vmatprep.subr.bf16.mxu1 %v331_v22 }
  0x11   :  { %334 = vmatpush3.bf16.msra.mxu1 %v331_v22 }
  0x12   :  { %336 = vmatprep.subr.bf16.mxu1 %v335_v25 }
  0x15   :  { %338 = vmatpush3.bf16.msra.mxu1 %v335_v25 }
  0x16   :  { %340 = vmatprep.subr.bf16.mxu1 %v339_v36 }
  0x19   :  { %342 = vmatpush3.bf16.msra.mxu1 %v339_v36 }
  0x1a   :  { %344 = vmatprep.subr.bf16.mxu1 %v343_v39 }
  0x1d   :  { %346 = vmatpush3.bf16.msra.mxu1 %v343_v39 }
  0x1e   :  { %348 = vmatprep.subr.bf16.mxu1 %v347_v43 }
  0x21   :  { %350 = vmatpush3.bf16.msra.mxu1 %v347_v43 }
  0x22   :  { %352 = vmatprep.subr.bf16.mxu1 %v351_v45 }
  0x25   :  { %354 = vmatpush3.bf16.msra.mxu1 %v351_v45 }
  0xdf   :  { %v279_v10 = vpop.f32.mrb[0].mxu0 }
  0xe0   :  { %v112_v11 = vpop.f32.mrb[1].mxu0  ;;  %v125_v13 = vsel %vm123_vm1, %v279_v10, -1e+30 }
  0xe1   :  { %v124_v12 = vsel %vm123_vm1, %v112_v11, -1e+30 }
  0xe2   :  { %126 = vmax.xlane.f32.xlu0 %v124_v12 }
  0xe6   :  { %128 = vmax.xlane.f32.xlu0 %v125_v13 }
 0x16f   :  { %v127_v26 = vpop.xlane.xlu0 %126 }
 0x170   :  { %v130_v27 = vsub.f32 %v124_v12, %v127_v26 }
 0x172   :  { %v132_v28 = vmul.f32 1.442695, %v130_v27 }
 0x173   :  { %v129_v29 = vpop.xlane.xlu0 %128 }
 0x174   :  { %358 = vpow2.f32 %v132_v28  ;;  %v131_v30 = vsub.f32 %v125_v13, %v129_v29 }
 0x176   :  { %v134_v31 = vmul.f32 1.442695, %v131_v30 }
 0x178   :  { %360 = vpow2.f32 %v134_v31 }
 0x17e   :  { %v359_v32 = vpop.eup %358 }
 0x17f   :  { %136 = vadd.xlane.f32.xlu1 %v359_v32 }
 0x182   :  { %v361_v33 = vpop.eup %360 }
 0x183   :  { %138 = vadd.xlane.f32.xlu1 %v361_v33 }
 0x20c   :  { %v137_v46 = vpop.xlane.xlu1 %136 }
 0x20d   :  { %362 = vrcp.f32 %v137_v46 }
 0x210   :  { %v139_v47 = vpop.xlane.xlu1 %138 }
 0x211   :  { %364 = vrcp.f32 %v139_v47 }
 0x217   :  { %v363_v48 = vpop.eup %362 }
 0x218   :  { %v142_v49 = vmul.f32 %v363_v48, %v359_v32 }
 0x21a   :  { %312 = vmatprep.mubr.f32.mxu1 %v142_v49  ;;  %219 = vst [vmem:[%s510_s4] sm:$0xff] %v142_v49 }
 0x21b   :  { %v365_v50 = vpop.eup %364 }
 0x21c   :  { %v143_v51 = vmul.f32 %v365_v50, %v361_v33 }
 0x21e   :  { %313 = vmatmul.mubr.f32.vlgmr.msra.gmra.mrb[0].mxu1 %v143_v51  ;;  %220 = vst [vmem:[%s510_s4 + $0x8] sm:$0xff] %v143_v51 }
 0x2f1   :  { %v314_v52 = vpop.f32.mrb[0].mxu1 }
 0x2f2   :  { %222 = vst.msk [vmem:[#allocation2 + $0x8] sm:$0xff] %vm39_vm0, %v314_v52  ;;  %v210_v53 = vpop.f32.mrb[1].mxu1 }
 0x2f3   :  { %221 = vst.msk [vmem:[#allocation2] sm:$0xff] %vm39_vm0, %v210_v53 }
 0x2f4   :  { %377 = shalt.err (!%p374_p4)
}
 0x2f5   :  { %s378_s4 = scalar_lea.hbm %s509_s3, 256 }
 0x2f6   :  { %p379_p5 = scmp.ne.s32.totalorder %s509_s3, %s378_s4  ;;  %p382_p6 = scmp.lt.u32.totalorder %s378_s4, %s509_s3 }
 0x2f8   :  { %p384_p7 = pnand %p382_p6, %p379_p5 }
 0x2fa   :  { %387 = shalt.err (!%p384_p7)
}
 0x2fb   :  { %s391_s15 = smov 128   ;;  %s392_s16 = smov 8  }
 0x2fc   :  { %234 = dma.vmem_to_hbm [thread:$0]  %s229_s7, 256, %s509_s3, [#allocation3], %s391_s15, %s391_s15, %s392_s16  }
 0x2fd   :  { %388 = dma.done.wait [#allocation3], 256  }
 0x2fe   :  { %389 = vsyncadd [#allocation3], 4294967040 }
 0x2ff   :  { %242 = vsyncpa [#allocation3], 1 }

</bundles_post_ra>
